<compile_context>
chip_gen: v7x
topology: tpu7x:2x2x1
jax: 0.10.0
libtpu: 0.0.40
codegen_flags: <defaults>
</compile_context>

<pallas_src>
import functools

import jax
import jax.numpy as jnp
from jax.experimental import pallas as pl
from jax.experimental.pallas import tpu as pltpu

_VMEM_LIMIT_BYTES = 64 * 1024 * 1024          # raise scoped VMEM (defaults: 16/32 MiB)
_DEFAULT_TILE_ELEMS = 512 * 2048              # ~4 MiB f32 per x tile


def _pick_tile(total: int, target: int, align: int) -> int:
    """Largest `align`-multiple divisor of `total` that is <= target, else the full axis.

    Exact division keeps the mean correct (no padded lanes in the reduction) and keeps
    blocks legal under the (8, 128) rule.  Non-divisible axes fall back to the full axis.
    """
    if total <= target:
        return total
    t = (min(target, total) // align) * align
    while t >= align:
        if total % t == 0:
            return t
        t -= align
    return total


# --------------------------- Pass 1: squeeze + excitation ---------------------------
def _excite_kernel(x_ref, w1t_ref, w2t_ref, s_ref, acc_ref, *, inv_len):
    # x_ref:   (1, C, lt)  input tile
    # w1t_ref: (C, H)      first Linear weight, pre-transposed (PyTorch weight is (H, C))
    # w2t_ref: (H, C)      second Linear weight, pre-transposed (PyTorch weight is (C, H))
    # s_ref:   (1, C, 1)   per-(batch, channel) sigmoid scale (output)
    # acc_ref: (1, C)      f32 running sum over L
    l = pl.program_id(1)

    @pl.when(l == 0)
    def _():
        acc_ref[...] = jnp.zeros_like(acc_ref)

    # f32 accumulation (safe for bf16 inputs too).
    acc_ref[...] += jnp.sum(x_ref[...].astype(jnp.float32), axis=-1)

    @pl.when(l == pl.num_programs(1) - 1)
    def _():
        y = acc_ref[...] * inv_len                                           # (1, C) mean
        h = jnp.dot(y, w1t_ref[...], preferred_element_type=jnp.float32)     # (1, H)
        h = jnp.maximum(h, 0.0)
        z = jnp.dot(h, w2t_ref[...], preferred_element_type=jnp.float32)     # (1, C)
        s_ref[...] = jax.nn.sigmoid(z)[:, :, None].astype(s_ref.dtype)


def _se_scale(x, w1, w2, *, max_tile_elems):
    b, c, l = x.shape
    h = w1.shape[0]
    w1t = w1.T  # (C, H) — glue transposes on tiny weights, done once outside the kernel
    w2t = w2.T  # (H, C)

    lt = _pick_tile(l, max(128, max_tile_elems // max(c, 1)), 128)
    grid = (b, l // lt)

    kernel = functools.partial(_excite_kernel, inv_len=1.0 / l)
    return pl.pallas_call(
        kernel,
        out_shape=jax.ShapeDtypeStruct((b, c, 1), jnp.float32),
        grid_spec=pltpu.PrefetchScalarGridSpec(
            num_scalar_prefetch=0,
            grid=grid,
            in_specs=[
                pl.BlockSpec((1, c, lt), lambda i, k: (i, 0, k)),
                pl.BlockSpec((c, h), lambda i, k: (0, 0)),   # VMEM-resident across grid
                pl.BlockSpec((h, c), lambda i, k: (0, 0)),
            ],
            out_specs=pl.BlockSpec((1, c, 1), lambda i, k: (i, 0, 0)),
            scratch_shapes=[pltpu.VMEM((1, c), jnp.float32)],
        ),
        compiler_params=pltpu.CompilerParams(
            dimension_semantics=("parallel", "arbitrary"),
            vmem_limit_bytes=_VMEM_LIMIT_BYTES,
        ),
    )(x, w1t, w2t)


# --------------------------- Pass 2: channel recalibration ---------------------------
def _scale_kernel(s_ref, x_ref, o_ref):
    # s_ref: (1, ct, 1); x_ref / o_ref: (1, ct, lt)
    o_ref[...] = (x_ref[...].astype(jnp.float32) * s_ref[...]).astype(o_ref.dtype)


def _apply_scale(x, s, *, max_tile_elems):
    b, c, l = x.shape
    # Prefer a long lane dim (dense stores), then tile C (sublanes) with the rest of budget.
    lt = _pick_tile(l, min(max(128, max_tile_elems), 2048), 128)
    ct = _pick_tile(c, max(8, max_tile_elems // lt), 8)
    grid = (b, c // ct, l // lt)

    return pl.pallas_call(
        _scale_kernel,
        out_shape=jax.ShapeDtypeStruct((b, c, l), x.dtype),
        grid_spec=pltpu.PrefetchScalarGridSpec(
            num_scalar_prefetch=0,
            grid=grid,
            in_specs=[
                pl.BlockSpec((1, ct, 1), lambda i, j, k: (i, j, 0)),
                pl.BlockSpec((1, ct, lt), lambda i, j, k: (i, j, k)),
            ],
            out_specs=pl.BlockSpec((1, ct, lt), lambda i, j, k: (i, j, k)),
        ),
        compiler_params=pltpu.CompilerParams(
            dimension_semantics=("parallel", "parallel", "parallel"),
            vmem_limit_bytes=_VMEM_LIMIT_BYTES,
        ),
        # TODO(synk): pass input_output_aliases={1: 0} here if the caller can donate x.
    )(s, x)


def squeeze_excitation(x, w1, w2, *, max_tile_elems=_DEFAULT_TILE_ELEMS):
    """x: (B, C, L); w1: (H, C); w2: (C, H) (PyTorch nn.Linear weight layout, no bias)."""
    s = _se_scale(x, w1, w2, max_tile_elems=max_tile_elems)
    return _apply_scale(x, s, max_tile_elems=max_tile_elems)


# --------------------------------- reference ---------------------------------
def reference(x, w1, w2):
    y = jnp.mean(x, axis=-1)                       # (B, C)
    hid = jnp.maximum(y @ w1.T, 0.0)               # (B, H)
    s = jax.nn.sigmoid(hid @ w2.T)                 # (B, C)
    return x * s[:, :, None]


if __name__ == "__main__":
    B, C, L = 2, 64, 256
    reduction = 16
    H = C // reduction  # 4

    key = jax.random.PRNGKey(0)
    kx, k1, k2 = jax.random.split(key, 3)

    x = jax.random.normal(kx, (B, C, L), dtype=jnp.float32)
    # PyTorch Linear weight layout: (out_features, in_features), no bias.
    w1 = jax.random.normal(k1, (H, C), dtype=jnp.float32) * (1.0 / jnp.sqrt(C))
    w2 = jax.random.normal(k2, (C, H), dtype=jnp.float32) * (1.0 / jnp.sqrt(H))

    ref = reference(x, w1, w2)

    # Default (large-tile) configuration.
    out = jax.block_until_ready(squeeze_excitation(x, w1, w2))
    assert out.shape == (B, C, L)
    assert jnp.allclose(out, ref, atol=1e-5, rtol=1e-5), "mismatch vs reference (default tiles)"

    # Small-tile configuration: forces a multi-step grid (2 L-reduction steps in pass 1,
    # 8 C-tiles per batch row in pass 2) so the accumulator + pipelined paths are exercised.
    out_tiled = jax.block_until_ready(squeeze_excitation(x, w1, w2, max_tile_elems=2048))
    assert jnp.allclose(out_tiled, ref, atol=1e-5, rtol=1e-5), "mismatch vs reference (small tiles)"

    print("KERNEL_OK")
</pallas_src>

<mosaic_0001>
module attributes {stable_mosaic.version = 11 : i64} {
  func.func @_excite_kernel(%arg0: i32, %arg1: i32, %arg2: memref<1x64x256xf32, #tpu.memory_space<vmem>>, %arg3: memref<64x4xf32, #tpu.memory_space<vmem>>, %arg4: memref<4x64xf32, #tpu.memory_space<vmem>>, %arg5: memref<1x64x1xf32, #tpu.memory_space<vmem>>, %arg6: memref<1x64xf32, #tpu.memory_space<vmem>>) attributes {dimension_semantics = [#tpu.dimension_semantics<parallel>, #tpu.dimension_semantics<arbitrary>], iteration_bounds = array<i64: 2, 1>, scalar_prefetch = 0 : i64, scratch_operands = 1 : i64, tpu.core_type = #tpu.core_type<tc>, window_params = [{transform_indices = @transform_0, window_bounds = array<i64: 1, 64, 256>}, {pipeline_mode = #tpu.pipeline_mode<synchronous>, transform_indices = @transform_1, window_bounds = array<i64: 64, 4>}, {pipeline_mode = #tpu.pipeline_mode<synchronous>, transform_indices = @transform_2, window_bounds = array<i64: 4, 64>}, {transform_indices = @transform_3, window_bounds = array<i64: 1, 64, 1>}]} {
    %c0_i32 = arith.constant 0 : i32
    %0 = arith.cmpi eq, %arg1, %c0_i32 : i32
    %1 = arith.extui %0 : i1 to i32
    %c0_i32_0 = arith.constant 0 : i32
    %2 = arith.cmpi ne, %1, %c0_i32_0 : i32
    scf.if %2 {
      %cst_9 = arith.constant 0.000000e+00 : f32
      %11 = vector.broadcast %cst_9 : f32 to vector<1x64xf32>
      %c0_10 = arith.constant 0 : index
      %c0_11 = arith.constant 0 : index
      %12 = vector.load %arg6[%c0_10, %c0_11] : memref<1x64xf32, #tpu.memory_space<vmem>>, vector<1x64xf32>
      tpu.vector_store %arg6[%c0_10, %c0_11], %11 {strides = array<i32>} : memref<1x64xf32, #tpu.memory_space<vmem>>, vector<1x64xf32>,
    } else {
    }
    %c0 = arith.constant 0 : index
    %c0_1 = arith.constant 0 : index
    %3 = vector.load %arg6[%c0, %c0_1] : memref<1x64xf32, #tpu.memory_space<vmem>>, vector<1x64xf32>
    %c0_2 = arith.constant 0 : index
    %c0_3 = arith.constant 0 : index
    %c0_4 = arith.constant 0 : index
    %4 = vector.load %arg2[%c0_2, %c0_3, %c0_4] : memref<1x64x256xf32, #tpu.memory_space<vmem>>, vector<1x64x256xf32>
    %cst = arith.constant dense<0.000000e+00> : vector<1x64xf32>
    %5 = vector.multi_reduction <add>, %4, %cst [2] : vector<1x64x256xf32> to vector<1x64xf32>
    %6 = arith.addf %3, %5 : vector<1x64xf32>
    %c0_5 = arith.constant 0 : index
    %c0_6 = arith.constant 0 : index
    %7 = vector.load %arg6[%c0_5, %c0_6] : memref<1x64xf32, #tpu.memory_space<vmem>>, vector<1x64xf32>
    tpu.vector_store %arg6[%c0_5, %c0_6], %6 {strides = array<i32>} : memref<1x64xf32, #tpu.memory_space<vmem>>, vector<1x64xf32>,
    %c0_i32_7 = arith.constant 0 : i32
    %8 = arith.cmpi eq, %arg1, %c0_i32_7 : i32
    %9 = arith.extui %8 : i1 to i32
    %c0_i32_8 = arith.constant 0 : i32
    %10 = arith.cmpi ne, %9, %c0_i32_8 : i32
    scf.if %10 {
      %c0_9 = arith.constant 0 : index
      %c0_10 = arith.constant 0 : index
      %11 = vector.load %arg6[%c0_9, %c0_10] : memref<1x64xf32, #tpu.memory_space<vmem>>, vector<1x64xf32>
      %cst_11 = arith.constant 3.906250e-03 : f32
      %12 = vector.broadcast %cst_11 : f32 to vector<1x64xf32>
      %13 = arith.mulf %11, %12 : vector<1x64xf32>
      %c0_12 = arith.constant 0 : index
      %c0_13 = arith.constant 0 : index
      %14 = vector.load %arg3[%c0_12, %c0_13] : memref<64x4xf32, #tpu.memory_space<vmem>>, vector<64x4xf32>
      %cst_14 = arith.constant dense<0.000000e+00> : vector<1x4xf32>
      %15 = tpu.matmul %13, %14, %cst_14 {dimension_numbers = #tpu.dot_dimension_numbers<[1], [0], [0], [1], [0, 0, 1, 1], [], []>} : vector<1x64xf32>, vector<64x4xf32>, vector<1x4xf32> -> vector<1x4xf32>
      %cst_15 = arith.constant 0.000000e+00 : f32
      %16 = vector.broadcast %cst_15 : f32 to vector<1x4xf32>
      %17 = arith.maximumf %15, %16 : vector<1x4xf32>
      %c0_16 = arith.constant 0 : index
      %c0_17 = arith.constant 0 : index
      %18 = vector.load %arg4[%c0_16, %c0_17] : memref<4x64xf32, #tpu.memory_space<vmem>>, vector<4x64xf32>
      %cst_18 = arith.constant dense<0.000000e+00> : vector<1x64xf32>
      %19 = tpu.matmul %17, %18, %cst_18 {dimension_numbers = #tpu.dot_dimension_numbers<[1], [0], [0], [1], [0, 0, 1, 1], [], []>} : vector<1x4xf32>, vector<4x64xf32>, vector<1x64xf32> -> vector<1x64xf32>
      %20 = arith.negf %19 : vector<1x64xf32>
      %21 = math.exp %20 : vector<1x64xf32>
      %cst_19 = arith.constant 1.000000e+00 : f32
      %22 = vector.broadcast %cst_19 : f32 to vector<1x64xf32>
      %23 = arith.addf %22, %21 : vector<1x64xf32>
      %24 = arith.divf %22, %23 : vector<1x64xf32>
      %25 = vector.shape_cast %24 : vector<1x64xf32> to vector<1x64x1xf32>
      %c0_20 = arith.constant 0 : index
      %c0_21 = arith.constant 0 : index
      %c0_22 = arith.constant 0 : index
      %26 = vector.load %arg5[%c0_20, %c0_21, %c0_22] : memref<1x64x1xf32, #tpu.memory_space<vmem>>, vector<1x64x1xf32>
      tpu.vector_store %arg5[%c0_20, %c0_21, %c0_22], %25 {strides = array<i32>} : memref<1x64x1xf32, #tpu.memory_space<vmem>>, vector<1x64x1xf32>,
    } else {
    }
    return
  }
  func.func @transform_0(%arg0: i32, %arg1: i32) -> (i32, i32, i32) {
    %c0_i32 = arith.constant 0 : i32
    %c0_i32_0 = arith.constant 0 : i32
    return %arg0, %c0_i32, %arg1 : i32, i32, i32
  }
  func.func @transform_1(%arg0: i32, %arg1: i32) -> (i32, i32) {
    %c0_i32 = arith.constant 0 : i32
    %c0_i32_0 = arith.constant 0 : i32
    %c0_i32_1 = arith.constant 0 : i32
    return %c0_i32, %c0_i32_0 : i32, i32
  }
  func.func @transform_2(%arg0: i32, %arg1: i32) -> (i32, i32) {
    %c0_i32 = arith.constant 0 : i32
    %c0_i32_0 = arith.constant 0 : i32
    %c0_i32_1 = arith.constant 0 : i32
    return %c0_i32, %c0_i32_0 : i32, i32
  }
  func.func @transform_3(%arg0: i32, %arg1: i32) -> (i32, i32, i32) {
    %c0_i32 = arith.constant 0 : i32
    %c0_i32_0 = arith.constant 0 : i32
    %c0_i32_1 = arith.constant 0 : i32
    return %arg0, %c0_i32, %c0_i32_0 : i32, i32, i32
  }
}

</mosaic_0001>

<bundles_post_ra>
// kernel: tpu_custom_call.1
= control target key start
LH: loop header
LB: loop body
LE: loop exit
PB: predicated region body
PF: predicated region fallthrough
CT: control target
= control target key end

     0   :  { %8 = vsyncpa [#allocation4], 0  ;;  %s2168_s0 = inlined_call_operand.hbm [shape: f32[2,64,256], index: 0, kind: input, shape index: {}]   ;;  %s2169_s1 = inlined_call_operand.hbm [shape: f32[64,4], index: 1, kind: input, shape index: {}]   ;;  %s2170_s2 = inlined_call_operand.hbm [shape: f32[4,64], index: 2, kind: input, shape index: {}]   ;;  %s2171_s3 = inlined_call_operand.hbm [shape: f32[2,64,1], index: 3, kind: output, shape index: {}]  }
   0x1   :  { %10 = vsyncpa [#allocation4 + $0x1], 0 }
   0x2   :  { %11 = vsyncpa [#allocation7], 0 }
   0x3   :  { %12 = vsyncpa [#allocation5], 0 }
   0x4   :  { %14 = vsyncpa [#allocation5 + $0x1], 0  ;;  %s1748_s12 = smov 0   ;;  %s1750_s13 = smov 0  }
   0x5   :  { %s1752_s14 = smov 0   ;;  %s1754_s15 = smov 0  }
   0x6   :  { %s1756_s16 = smov 0   ;;  %s1758_s17 = smov 0  }
   0x7 LB: > { %s1367_s18 = sadd.s32 4294967295, %s1711_s17   ;;  %s1368_s19 = sadd.s32 4294967294, %s1711_s17   ;;  %s1711_s17 = sphi %s1758_s17, %s20_s17   ;;  %s1707_s16 = sphi %s1756_s16, %s2193_s16   ;;  %s1703_s15 = sphi %s1754_s15, %s2192_s15   ;;  %s1699_s14 = sphi %s1752_s14, %s2191_s14   ;;  %s1695_s13 = sphi %s1750_s13, %s2190_s13   ;;  %s1691_s12 = sphi %s1748_s12, %s2189_s12  }
   0x8   : > { %p54_p0 = scmp.ne.s32.totalorder %s1695_s13, %s1691_s12  ;;  %p1782_p1 = scmp.eq.s32.totalorder %s1367_s18, 0 }
   0x9   : > { %p1786_p2 = scmp.eq.s32.totalorder %s1367_s18, 1  ;;  %p126_p3 = scmp.eq.s32.totalorder %s1368_s19, 1 }
   0xa   : > { %s2176_s20 = scalar_select %p1782_p1, 1, 0 }
   0xb   : > { %p1792_p4 = por %p1782_p1, %p54_p0  ;;  %p1369_p5 = scmp.ge.s32.totalorder %s1711_s17, 1 }
   0xc   : > { %p1797_p6 = por %p126_p3, %p54_p0  ;;  %p133_p7 = scmp.lt.s32.totalorder %s1711_s17, 3 }
   0xd   : > { %s2178_s22 = scalar_select %p1792_p4, 1, 0 }
   0xe   : > { %s2179_s23 = scalar_select %p1797_p6, 1, 0 }
   0xf   : > { %p1802_p8 = pnand %p1369_p5, %p133_p7  ;;  %s1713_s25 = smov [#allocation6]  }
  0x10   : > { %s145_s26 = sshll.u32 %s1713_s25, 4  ;;  %s1714_s28 = smov [#allocation8]   ;;  %s1806_s26 = int_to_ptr.vmem [resolvable:$true] %s145_s26 }
  0x11   : > { %p1451_p9 = pneg %p1802_p8  ;;  %s159_s29 = sshll.u32 %s1714_s28, 4  ;;  %s1817_s29 = int_to_ptr.vmem [resolvable:$true] %s159_s29 }
  0x12   : > { %s1539_s5 = scalar_lea.hbm %s2169_s1, 1024 }
  0x13   : > { %p1813_p11 = pnand %p1451_p9, %p1782_p1  ;;  %p1540_p12 = scmp.ne.s32.totalorder %s2169_s1, %s1539_s5 }
  0x14   : > { %p1546_p5 = scmp.lt.u32.totalorder %s1539_s5, %s2169_s1 }
  0x15   : > { %p1541_p13 = pneg %p1813_p11 }
  0x17   : > { %p1542_p0 = pnand %p1541_p13, %p1540_p12 }
  0x19   : > { %p1543_p3 = pneg %p1542_p0 }
  0x1b   : > { %p1548_p7 = pnand %p1546_p5, %p1543_p3 }
  0x1d   : > { %1551 = shalt.err (!%p1548_p7)
}
  0x1e   : > { %s1552_s10 = scalar_lea.vmem %s1806_s26, 1024  ;;  %p1560_p1 = scmp.lt.s32.totalorder %s1806_s26, %s1806_s26 }
  0x1f   : > { %p1553_p9 = scmp.ne.s32.totalorder %s1806_s26, %s1552_s10  ;;  %p1561_p12 = scmp.lt.s32.totalorder %s1552_s10, %s1552_s10 }
  0x21   : > { %p1555_p10 = pnand %p1553_p9, %p1541_p13  ;;  %p1562_p0 = por %p1561_p12, %p1560_p1 }
  0x23   : > { %p1556_p6 = pneg %p1555_p10 }
  0x25   : > { %p1563_p4 = pnand %p1562_p0, %p1556_p6 }
  0x27   : > { %1566 = shalt.err (!%p1563_p4)
}
  0x28   : > { %s1715_s11 = smov 128   ;;  %s1716_s18 = smov 8  }
  0x29   : > { %1454 = dma.hbm_to_vmem [thread:$0]  (!%p1813_p11), %s2169_s1, 1024, %s1806_s26, [#allocation7], %s1715_s11, %s1715_s11, %s1716_s18  }
  0x2a   : > { %s1567_s4 = scalar_lea.hbm %s2170_s2, 64 }
  0x2b   : > { %p1568_p1 = scmp.ne.s32.totalorder %s2170_s2, %s1567_s4  ;;  %p1574_p10 = scmp.lt.u32.totalorder %s1567_s4, %s2170_s2 }
  0x2d   : > { %p1570_p4 = pnand %p1568_p1, %p1541_p13 }
  0x2f   : > { %p1571_p6 = pneg %p1570_p4 }
  0x31   : > { %p1576_p3 = pnand %p1574_p10, %p1571_p6 }
  0x33   : > { %1579 = shalt.err (!%p1576_p3)
}
  0x34   : > { %s1580_s26 = scalar_lea.vmem %s1817_s29, 64  ;;  %p1588_p12 = scmp.lt.s32.totalorder %s1817_s29, %s1817_s29 }
  0x35   : > { %p1581_p5 = scmp.ne.s32.totalorder %s1817_s29, %s1580_s26  ;;  %p1589_p0 = scmp.lt.s32.totalorder %s1580_s26, %s1580_s26 }
  0x37   : > { %p1583_p7 = pnand %p1581_p5, %p1541_p13  ;;  %p1590_p1 = por %p1589_p0, %p1588_p12 }
  0x39   : > { %p1584_p9 = pneg %p1583_p7 }
  0x3b   : > { %p1591_p4 = pnand %p1590_p1, %p1584_p9 }
  0x3d   : > { %1594 = shalt.err (!%p1591_p4)
}
  0x3e   : > { %1457 = dma.hbm_to_vmem [thread:$0]  (!%p1813_p11), %s2170_s2, 64, %s1817_s29, [#allocation7]  }
  0x3f   : > { %s32_s11 = sadd.s32 1, %s1707_s16  ;;  %s41_s18 = sadd.s32 1, %s1699_s14 }
  0x40   : > { %p34_p13 = scmp.ge.s32.totalorder %s32_s11, 2  ;;  %p48_p6 = scmp.ne.s32.totalorder %s1699_s14, %s1695_s13 }
  0x41   : > { %p49_p10 = scmp.eq.s32.totalorder %s1711_s17, 0  ;;  %p1468_p3 = scmp.lt.s32.totalorder %s1711_s17, 2 }
  0x42   : > { %s2195_s11 = smov (%p34_p13, %s32_s11), 0  ;;  %p1881_p7 = por %p1786_p2, %p48_p6 }
  0x43   : > { %p50_p5 = por %p49_p10, %p48_p6  ;;  %s36_s19 = ssub.s32 %s1707_s16, %s2195_s11 }
  0x44   : > { %s2182_s27 = scalar_select %p1881_p7, 1, 0 }
  0x45   : > { %s170_s25 = sand.u32 1, %s1699_s14   ;;  %p39_p9 = scmp.eq.s32.totalorder %s36_s19, 0 }
  0x46   : > { %s1373_s29 = sshll.u32 %s170_s25, 7  ;;  %s1390_s28 = sshll.u32 %s1707_s16, 11 }
  0x47   : > { %s1890_s30 = scalar_select %p39_p9, %s1699_s14, %s41_s18  }
  0x48   : > { %s1895_s6 = scalar_lea.hbm %s2168_s0, %s1390_s28  ;;  %s174_s21 = scalar_lea.vmem [#allocation3], %s1373_s29 }
  0x49   : > { %s183_s7 = sshll.u32 %s174_s21, 4  ;;  %p1899_p2 = pnand %p1468_p3, %p50_p5  ;;  %s1903_s7 = int_to_ptr.vmem [resolvable:$true] %s183_s7 }
  0x4a   : > { %s1905_s26 = scalar_lea.sflag [#allocation4], %s170_s25  ;;  %s1595_s9 = scalar_lea.hbm %s1895_s6, 2048 }
  0x4b   : > { %p1596_p11 = scmp.ne.s32.totalorder %s1895_s6, %s1595_s9  ;;  %p1597_p12 = pneg %p1899_p2 }
  0x4c   : > { %s1600_s19 = scalar_lea.hbm %s2168_s0, 4096  ;;  %p1601_p4 = scmp.lt.u32.totalorder %s1895_s6, %s2168_s0 }
  0x4d   : > { %p1598_p0 = pnand %p1597_p12, %p1596_p11  ;;  %p1602_p13 = scmp.lt.u32.totalorder %s1600_s19, %s1595_s9 }
  0x4e   : > { %p1604_p10 = scmp.lt.u32.totalorder %s1595_s9, %s1895_s6 }
  0x4f   : > { %p1599_p1 = pneg %p1598_p0  ;;  %p1603_p6 = por %p1602_p13, %p1601_p4 }
  0x51   : > { %p1605_p3 = por %p1604_p10, %p1603_p6 }
  0x53   : > { %p1606_p5 = pnand %p1605_p3, %p1599_p1 }
  0x55   : > { %1609 = shalt.err (!%p1606_p5)
}
  0x56   : > { %s1610_s25 = scalar_lea.vmem %s1903_s7, 2048  ;;  %s1717_s4 = smov [#allocation3]  }
  0x57   : > { %p1611_p9 = scmp.ne.s32.totalorder %s1903_s7, %s1610_s25  ;;  %s1615_s5 = sshll.u32 %s1717_s4, 4  ;;  %s1616_s5 = int_to_ptr.vmem [resolvable:$false] %s1615_s5 }
  0x58   : > { %s1617_s21 = scalar_lea.vmem %s1616_s5, 4096  ;;  %p1618_p7 = scmp.lt.s32.totalorder %s1903_s7, %s1616_s5 }
  0x59   : > { %p1613_p11 = pnand %p1611_p9, %p1597_p12  ;;  %p1619_p4 = scmp.lt.s32.totalorder %s1617_s21, %s1610_s25 }
  0x5b   : > { %p1614_p0 = pneg %p1613_p11  ;;  %p1620_p13 = por %p1619_p4, %p1618_p7 }
  0x5d   : > { %p1621_p6 = pnand %p1620_p13, %p1614_p0 }
  0x5f   : > { %1624 = shalt.err (!%p1621_p6)
}
  0x60   : > { %s1718_s9 = smov 256   ;;  %s1719_s10 = smov 16  }
  0x61   : > { %1461 = dma.hbm_to_vmem [thread:$0]  (!%p1899_p2), %s1895_s6, 2048, %s1903_s7, %s1905_s26, %s1718_s9, %s1718_s9, %s1719_s10  }
  0x62   : > { %195 = sbr.rel (%p1802_p8) target bundleno = 1046 (0x416), region = 32  ;;  %s1936_s18 = sand.u32 (!%p1802_p8), 1, %s1695_s13  }
  0x63   : > { %s1377_s19 = sshll.u32 (!%p1802_p8), %s1936_s18, 7  ;;  %s198_s29 = scalar_lea.sflag (!%p1802_p8), [#allocation4], %s1936_s18 }
  0x64   : > { %s201_s28 = scalar_lea.vmem (!%p1802_p8), [#allocation3], %s1377_s19  ;;  %p2184_p7 = scmp.ne.s32.totalorder (!%p1802_p8), %s2178_s22, 0 }
  0x69   : > { %1678 = dma.done.wait (%p2184_p7), %s198_s29, 2048  }
  0x6a   : > { %1680 = vsyncadd (%p2184_p7), %s198_s29, 4294965248  ;;  %p2185_p12 = scmp.ne.s32.totalorder %s2176_s20, 0 }
  0x6c   : > { %1682 = dma.done.wait (%p2185_p12), [#allocation7], 1088  }
  0x6d   : > { %1684 = vsyncadd (%p2185_p12), [#allocation7], 4294966208  ;;  %v240_v0 = vld [vmem:[%s201_s28] sm:$0xff]  ;;  %v241_v1 = vld [vmem:[%s201_s28 + $0x8] sm:$0xff]  ;;  %v1720_v24 = vmov 0   ;;  %v288_v25 = vlaneseq  ;;  %vm237_vm0 = vcmask 516096  }
  0x6e   : > { %v242_v2 = vld [vmem:[%s201_s28 + $0x10] sm:$0xff]  ;;  %v256_v3 = vadd.f32 %v241_v1, %v240_v0  ;;  %v243_v4 = vld [vmem:[%s201_s28 + $0x18] sm:$0xff]  ;;  %v244_v5 = vld [vmem:[%s201_s28 + $0x20] sm:$0xff]  ;;  %1533 = vset.pattern.permute.xlu0 %v1720_v24  ;;  %1534 = vset.pattern.permute.xlu1 %v1720_v24  ;;  %v1721_v26 = vmov 1966171168   ;;  %vm1724_vm1 = vmmov 0  }
  0x6f   : > { %v245_v6 = vld [vmem:[%s201_s28 + $0x28] sm:$0xff]  ;;  %v246_v8 = vld [vmem:[%s201_s28 + $0x30] sm:$0xff]  ;;  %v247_v9 = vld [vmem:[%s201_s28 + $0x38] sm:$0xff]  ;;  %v259_v10 = vadd.f32 %v243_v4, %v242_v2  ;;  %v549_v27 = vunpack.c.l.s4 %v1721_v26  ;;  %v1949_v28 = vshrl.u32 %v288_v25, 7  ;;  %vm971_vm2 = vcmask 130112   ;;  %s1380_s20 = sshll.u32 %s1936_s18, 6 }
  0x70   : > { %v262_v7 = vadd.f32 %v245_v6, %v244_v5  ;;  %257 = vadd.xlane.f32.xlu0 %v256_v3  ;;  %v265_v11 = vadd.f32 %v247_v9, %v246_v8  ;;  %v248_v12 = vld [vmem:[%s201_s28 + $0x40] sm:$0xff]  ;;  %v249_v13 = vld [vmem:[%s201_s28 + $0x48] sm:$0xff]  ;;  %v250_v14 = vld [vmem:[%s201_s28 + $0x50] sm:$0xff]  ;;  %vm978_vm3 = vcmask 195712   ;;  %vm985_vm4 = vcmask 261312   ;;  %s231_s22 = scalar_lea.vmem [#allocation9], %s1380_s20 }
  0x71   : > { %v251_v15 = vld [vmem:[%s201_s28 + $0x58] sm:$0xff]  ;;  %v268_v16 = vadd.f32 %v249_v13, %v248_v12  ;;  %v252_v18 = vld [vmem:[%s201_s28 + $0x60] sm:$0xff]  ;;  %v253_v19 = vld [vmem:[%s201_s28 + $0x68] sm:$0xff]  ;;  %v550_v29 = vunpack.c.0.s8 %v549_v27  ;;  %v1952_v30 = vsub.s32 0, %v1949_v28  ;;  %v1955_v31 = vsub.s32 1, %v1949_v28  ;;  %s1264_s24 = sshll.u32 %s231_s22, 4  ;;  %s2110_s24 = int_to_ptr.vmem [resolvable:$true] %s1264_s24 }
  0x72   : > { %263 = vadd.xlane.f32.xlu1 %v262_v7  ;;  %v271_v17 = vadd.f32 %v251_v15, %v250_v14  ;;  %v254_v20 = vld [vmem:[%s201_s28 + $0x70] sm:$0xff]  ;;  %v255_v21 = vld [vmem:[%s201_s28 + $0x78] sm:$0xff]  ;;  %v274_v22 = vadd.f32 %v253_v19, %v252_v18  ;;  %v1958_v32 = vsub.s32 2, %v1949_v28  ;;  %v1961_v33 = vsub.s32 3, %v1949_v28  ;;  %s1391_s6 = sshll.u32 %s1703_s15, 10  ;;  %s1251_s15 = scalar_lea.sflag [#allocation5], %s1936_s18 }
  0x73   : > { %v277_v23 = vadd.f32 %v255_v21, %v254_v20  ;;  %v1964_v34 = vsub.s32 4, %v1949_v28  ;;  %v1967_v35 = vsub.s32 5, %v1949_v28  ;;  %v1970_v36 = vsub.s32 6, %v1949_v28  ;;  %s2117_s26 = scalar_lea.hbm %s2171_s3, %s1391_s6  ;;  %s1625_s25 = scalar_lea.vmem %s2110_s24, 1024 }
  0x74   : > { %260 = vadd.xlane.f32.xlu0 %v259_v10  ;;  %v1973_v37 = vsub.s32 7, %v1949_v28  ;;  %v1976_v39 = vsub.s32 %v550_v29, %v1949_v28  ;;  %vm992_vm5 = vcmask 326912   ;;  %vm999_vm6 = vcmask 392512   ;;  %p1626_p8 = scmp.ne.s32.totalorder %s2110_s24, %s1625_s25  ;;  %p2186_p2 = scmp.ne.s32.totalorder %s2182_s27, 0 }
  0x75   : > { %vm1006_vm7 = vcmask 458112   ;;  %vm1013_vm8 = vcmask 523712   ;;  %vm1046_vm9 = vcmask 523264   ;;  %vm1126_vm10 = vcmask 1043456   ;;  %s1725_s4 = smov [#allocation9]  }
  0x76   : > { %266 = vadd.xlane.f32.xlu1 %v265_v11  ;;  %vm1122_vm11 = vcmask 31744   ;;  %vm1241_vm12 = vcmask 7168   ;;  %p1627_p1 = pnand %p1626_p8, %p2186_p2  ;;  %s1629_s5 = sshll.u32 %s1725_s4, 4  ;;  %s1630_s5 = int_to_ptr.vmem [resolvable:$false] %s1629_s5 }
  0x77   : > { %s1631_s21 = scalar_lea.vmem %s1630_s5, 2048  ;;  %p1632_p3 = scmp.lt.s32.totalorder %s2110_s24, %s1630_s5 }
  0x78   : > { %269 = vadd.xlane.f32.xlu0 %v268_v16  ;;  %p1628_p10 = pneg %p1627_p1  ;;  %p1633_p5 = scmp.lt.s32.totalorder %s1631_s21, %s1625_s25 }
  0x7a   : > { %272 = vadd.xlane.f32.xlu1 %v271_v17  ;;  %p1634_p9 = por %p1633_p5, %p1632_p3 }
  0x7c   : > { %275 = vadd.xlane.f32.xlu0 %v274_v22  ;;  %p1635_p11 = pnand %p1634_p9, %p1628_p10 }
  0x7e   : > { %278 = vadd.xlane.f32.xlu1 %v277_v23 }
  0xfd   : > { %v258_v38 = vpop.xlane.xlu0 %257 }
  0xfe   : > { %v291_v41 = vrot.slane %v258_v38, %v1952_v30  ;;  %v295_v42 = vrot.slane %v258_v38, %v1955_v31  ;;  %v299_v43 = vrot.slane %v258_v38, %v1958_v32  ;;  %v303_v44 = vrot.slane %v258_v38, %v1961_v33 }
  0xff   : > { %v264_v40 = vpop.xlane.xlu1 %263  ;;  %v307_v45 = vrot.slane %v258_v38, %v1964_v34  ;;  %v311_v46 = vrot.slane %v258_v38, %v1967_v35  ;;  %v315_v47 = vrot.slane %v258_v38, %v1970_v36  ;;  %v319_v48 = vrot.slane %v258_v38, %v1973_v37 }
 0x100   : > { %v544_v49 = vcombine.low %v291_v41, %v295_v42  ;;  %v545_v50 = vcombine.low %v299_v43, %v303_v44  ;;  %v355_v51 = vrot.slane %v264_v40, %v1952_v30  ;;  %v359_v52 = vrot.slane %v264_v40, %v1955_v31 }
 0x101   : > { %v261_v53 = vpop.xlane.xlu0 %260  ;;  %v546_v54 = vcombine.low %v307_v45, %v311_v46  ;;  %v547_v55 = vcombine.low %v315_v47, %v319_v48  ;;  %v363_v56 = vrot.slane %v264_v40, %v1958_v32  ;;  %v367_v57 = vrot.slane %v264_v40, %v1961_v33 }
 0x102   : > { %v554_v58 = vrot.slane %v544_v49, %v1976_v39  ;;  %v561_v59 = vrot.slane %v545_v50, %v1976_v39  ;;  %v323_v60 = vrot.slane %v261_v53, %v1952_v30  ;;  %v327_v61 = vrot.slane %v261_v53, %v1955_v31 }
 0x103   : > { %v568_v62 = vrot.slane %v546_v54, %v1976_v39  ;;  %v575_v63 = vrot.slane %v547_v55, %v1976_v39  ;;  %v331_v0 = vrot.slane %v261_v53, %v1958_v32  ;;  %v335_v1 = vrot.slane %v261_v53, %v1961_v33  ;;  %v267_v14 = vpop.xlane.xlu1 %266 }
 0x104   : > { %v576_v2 = vcombine.low %v554_v58, %v561_v59  ;;  %v339_v3 = vrot.slane %v261_v53, %v1964_v34  ;;  %v343_v4 = vrot.slane %v261_v53, %v1967_v35  ;;  %v347_v5 = vrot.slane %v261_v53, %v1970_v36 }
 0x105   : > { %v577_v6 = vcombine.low %v568_v62, %v575_v63  ;;  %v351_v7 = vrot.slane %v261_v53, %v1973_v37  ;;  %v593_v8 = vcombine.low %v323_v60, %v327_v61  ;;  %v594_v9 = vcombine.low %v331_v0, %v335_v1  ;;  %v270_v50 = vpop.xlane.xlu0 %269 }
 0x106   : > { %v584_v10 = vrot.slane %v576_v2, %v1976_v39  ;;  %v595_v11 = vcombine.low %v339_v3, %v343_v4  ;;  %v371_v12 = vrot.slane %v264_v40, %v1964_v34  ;;  %v375_v13 = vrot.slane %v264_v40, %v1967_v35 }
 0x107   : > { %v591_v15 = vrot.slane %v577_v6, %v1976_v39  ;;  %v596_v16 = vcombine.low %v347_v5, %v351_v7  ;;  %v603_v17 = vrot.slane %v593_v8, %v1976_v39  ;;  %v610_v18 = vrot.slane %v594_v9, %v1976_v39  ;;  %v273_v3 = vpop.xlane.xlu1 %272 }
 0x108   : > { %v617_v19 = vrot.slane %v595_v11, %v1976_v39  ;;  %v379_v20 = vrot.slane %v264_v40, %v1970_v36  ;;  %v383_v21 = vrot.slane %v264_v40, %v1973_v37  ;;  %v642_v22 = vcombine.low %v355_v51, %v359_v52 }
 0x109   : > { %v592_v23 = vcombine.low %v584_v10, %v591_v15  ;;  %v624_v24 = vrot.slane %v596_v16, %v1976_v39  ;;  %v625_v26 = vcombine.low %v603_v17, %v610_v18  ;;  %v643_v27 = vcombine.low %v363_v56, %v367_v57 }
 0x10a   : > { %v644_v29 = vcombine.low %v371_v12, %v375_v13  ;;  %v645_v38 = vcombine.low %v379_v20, %v383_v21  ;;  %v652_v41 = vrot.slane %v642_v22, %v1976_v39  ;;  %v387_v42 = vrot.slane %v267_v14, %v1952_v30 }
 0x10b   : > { %937 = vperm.xlu0 %1533, %v592_v23   ;;  %v626_v43 = vcombine.low %v617_v19, %v624_v24  ;;  %v633_v44 = vrot.slane %v625_v26, %v1976_v39  ;;  %v659_v45 = vrot.slane %v643_v27, %v1976_v39  ;;  %v391_v40 = vrot.slane %v267_v14, %v1955_v31 }
 0x10c   : > { %v666_v46 = vrot.slane %v644_v29, %v1976_v39  ;;  %v673_v47 = vrot.slane %v645_v38, %v1976_v39  ;;  %v395_v48 = vrot.slane %v267_v14, %v1958_v32  ;;  %v399_v49 = vrot.slane %v267_v14, %v1961_v33  ;;  %v276_v38 = vpop.xlane.xlu0 %275 }
 0x10d   : > { %v640_v51 = vrot.slane %v626_v43, %v1976_v39  ;;  %v674_v52 = vcombine.low %v652_v41, %v659_v45  ;;  %v403_v53 = vrot.slane %v267_v14, %v1964_v34  ;;  %v407_v54 = vrot.slane %v267_v14, %v1967_v35 }
 0x10e   : > { %v675_v55 = vcombine.low %v666_v46, %v673_v47  ;;  %v411_v56 = vrot.slane %v267_v14, %v1970_v36  ;;  %v415_v57 = vrot.slane %v267_v14, %v1973_v37  ;;  %v691_v58 = vcombine.low %v387_v42, %v391_v40 }
 0x10f   : > { %v641_v59 = vcombine.low %v633_v44, %v640_v51  ;;  %v682_v60 = vrot.slane %v674_v52, %v1976_v39  ;;  %v692_v61 = vcombine.low %v395_v48, %v399_v49  ;;  %v693_v62 = vcombine.low %v403_v53, %v407_v54 }
 0x110   : > { %v689_v63 = vrot.slane %v675_v55, %v1976_v39  ;;  %v694_v0 = vcombine.low %v411_v56, %v415_v57  ;;  %v701_v1 = vrot.slane %v691_v58, %v1976_v39  ;;  %v419_v2 = vrot.slane %v270_v50, %v1952_v30 }
 0x111   : > { %940 = vperm.xlu1 %1534, %v641_v59   ;;  %v708_v4 = vrot.slane %v692_v61, %v1976_v39  ;;  %v715_v5 = vrot.slane %v693_v62, %v1976_v39  ;;  %v423_v6 = vrot.slane %v270_v50, %v1955_v31  ;;  %v427_v7 = vrot.slane %v270_v50, %v1958_v32 }
 0x112   : > { %v690_v8 = vcombine.low %v682_v60, %v689_v63  ;;  %v722_v9 = vrot.slane %v694_v0, %v1976_v39  ;;  %v431_v10 = vrot.slane %v270_v50, %v1961_v33  ;;  %v435_v11 = vrot.slane %v270_v50, %v1964_v34  ;;  %v279_v60 = vpop.xlane.xlu1 %278 }
 0x113   : > { %v723_v12 = vcombine.low %v701_v1, %v708_v4  ;;  %v439_v13 = vrot.slane %v270_v50, %v1967_v35  ;;  %v443_v14 = vrot.slane %v270_v50, %v1970_v36  ;;  %v447_v15 = vrot.slane %v270_v50, %v1973_v37 }
 0x114   : > { %v724_v16 = vcombine.low %v715_v5, %v722_v9  ;;  %v740_v17 = vcombine.low %v419_v2, %v423_v6  ;;  %v741_v18 = vcombine.low %v427_v7, %v431_v10  ;;  %v451_v19 = vrot.slane %v273_v3, %v1952_v30 }
 0x115   : > { %943 = vperm.xlu1 %1534, %v690_v8   ;;  %v731_v20 = vrot.slane %v723_v12, %v1976_v39  ;;  %v742_v21 = vcombine.low %v435_v11, %v439_v13  ;;  %v743_v22 = vcombine.low %v443_v14, %v447_v15  ;;  %v455_v23 = vrot.slane %v273_v3, %v1955_v31 }
 0x116   : > { %v738_v24 = vrot.slane %v724_v16, %v1976_v39  ;;  %v750_v26 = vrot.slane %v740_v17, %v1976_v39  ;;  %v757_v27 = vrot.slane %v741_v18, %v1976_v39  ;;  %v459_v29 = vrot.slane %v273_v3, %v1958_v32 }
 0x117   : > { %v764_v41 = vrot.slane %v742_v21, %v1976_v39  ;;  %v771_v42 = vrot.slane %v743_v22, %v1976_v39  ;;  %v463_v43 = vrot.slane %v273_v3, %v1961_v33  ;;  %v467_v44 = vrot.slane %v273_v3, %v1964_v34 }
 0x118   : > { %v739_v45 = vcombine.low %v731_v20, %v738_v24  ;;  %v772_v40 = vcombine.low %v750_v26, %v757_v27  ;;  %v471_v46 = vrot.slane %v273_v3, %v1967_v35  ;;  %v475_v47 = vrot.slane %v273_v3, %v1970_v36 }
 0x119   : > { %v773_v48 = vcombine.low %v764_v41, %v771_v42  ;;  %v479_v49 = vrot.slane %v273_v3, %v1973_v37  ;;  %v789_v50 = vcombine.low %v451_v19, %v455_v23  ;;  %v790_v51 = vcombine.low %v459_v29, %v463_v43 }
 0x11a   : > { %946 = vperm.xlu1 %1534, %v739_v45   ;;  %v780_v52 = vrot.slane %v772_v40, %v1976_v39  ;;  %v791_v53 = vcombine.low %v467_v44, %v471_v46  ;;  %v483_v54 = vrot.slane %v276_v38, %v1952_v30  ;;  %v487_v55 = vrot.slane %v276_v38, %v1955_v31 }
 0x11b   : > { %v787_v56 = vrot.slane %v773_v48, %v1976_v39  ;;  %v792_v57 = vcombine.low %v475_v47, %v479_v49  ;;  %v799_v58 = vrot.slane %v789_v50, %v1976_v39  ;;  %v806_v59 = vrot.slane %v790_v51, %v1976_v39  ;;  %v1038_v50 = vld [vmem:[#allocation6] sm:$0xff]  ;;  %v1039_v51 = vld [vmem:[#allocation6 + $0x8] sm:$0xff] }
 0x11c   : > { %v813_v61 = vrot.slane %v791_v53, %v1976_v39  ;;  %v491_v62 = vrot.slane %v276_v38, %v1958_v32  ;;  %v495_v63 = vrot.slane %v276_v38, %v1961_v33  ;;  %v499_v0 = vrot.slane %v276_v38, %v1964_v34 }
 0x11d   : > { %v788_v1 = vcombine.low %v780_v52, %v787_v56  ;;  %v820_v2 = vrot.slane %v792_v57, %v1976_v39  ;;  %v821_v3 = vcombine.low %v799_v58, %v806_v59  ;;  %v503_v4 = vrot.slane %v276_v38, %v1967_v35  ;;  %v1042_v56 = vld [vmem:[#allocation6 + $0x20] sm:$0xff]  ;;  %v1043_v58 = vld [vmem:[#allocation6 + $0x28] sm:$0xff] }
 0x11e   : > { %v507_v5 = vrot.slane %v276_v38, %v1970_v36  ;;  %v511_v6 = vrot.slane %v276_v38, %v1973_v37  ;;  %v838_v7 = vcombine.low %v483_v54, %v487_v55  ;;  %v839_v8 = vcombine.low %v491_v62, %v495_v63  ;;  %v1040_v54 = vld [vmem:[#allocation6 + $0x10] sm:$0xff]  ;;  %v1041_v55 = vld [vmem:[#allocation6 + $0x18] sm:$0xff] }
 0x11f   : > { %949 = vperm.xlu1 %1534, %v788_v1   ;;  %v822_v9 = vcombine.low %v813_v61, %v820_v2  ;;  %v829_v10 = vrot.slane %v821_v3, %v1976_v39  ;;  %v840_v11 = vcombine.low %v499_v0, %v503_v4  ;;  %v515_v12 = vrot.slane %v279_v60, %v1952_v30  ;;  %v1045_v61 = vld [vmem:[#allocation6 + $0x38] sm:$0xff] }
 0x120   : > { %v841_v13 = vcombine.low %v507_v5, %v511_v6  ;;  %v848_v14 = vrot.slane %v838_v7, %v1976_v39  ;;  %v855_v15 = vrot.slane %v839_v8, %v1976_v39  ;;  %v519_v16 = vrot.slane %v279_v60, %v1955_v31 }
 0x121   : > { %v836_v17 = vrot.slane %v822_v9, %v1976_v39  ;;  %v862_v18 = vrot.slane %v840_v11, %v1976_v39  ;;  %v523_v19 = vrot.slane %v279_v60, %v1958_v32  ;;  %v527_v20 = vrot.slane %v279_v60, %v1961_v33 }
 0x122   : > { %v869_v21 = vrot.slane %v841_v13, %v1976_v39  ;;  %v870_v22 = vcombine.low %v848_v14, %v855_v15  ;;  %v531_v23 = vrot.slane %v279_v60, %v1964_v34  ;;  %v535_v24 = vrot.slane %v279_v60, %v1967_v35 }
 0x123   : > { %v837_v26 = vcombine.low %v829_v10, %v836_v17  ;;  %v539_v27 = vrot.slane %v279_v60, %v1970_v36  ;;  %v543_v31 = vrot.slane %v279_v60, %v1973_v37  ;;  %v887_v29 = vcombine.low %v515_v12, %v519_v16  ;;  %v1044_v60 = vld [vmem:[#allocation6 + $0x30] sm:$0xff] }
 0x124   : > { %v871_v38 = vcombine.low %v862_v18, %v869_v21  ;;  %v878_v41 = vrot.slane %v870_v22, %v1976_v39  ;;  %v888_v42 = vcombine.low %v523_v19, %v527_v20  ;;  %v889_v32 = vcombine.low %v531_v23, %v535_v24 }
 0x125   : > { %952 = vperm.xlu1 %1534, %v837_v26   ;;  %v890_v33 = vcombine.low %v539_v27, %v543_v31  ;;  %v897_v43 = vrot.slane %v887_v29, %v1976_v39  ;;  %v1722_v49 = vmov 0.0   ;;  %v1428_v52 = vpack.c.bf16 %v1039_v51, %v1038_v50 }
 0x126   : > { %v885_v44 = vrot.slane %v871_v38, %v1976_v39  ;;  %v904_v34 = vrot.slane %v888_v42, %v1976_v39  ;;  %v911_v35 = vrot.slane %v889_v32, %v1976_v39  ;;  %238 = vst.msk [vmem:[#allocation2] sm:$0x1] %vm237_vm0, %v1722_v49  ;;  %1422 = vmatprep.subr.mxu1 %v1722_v49  ;;  %v1723_v53 = vmov 0.0|0.0  }
 0x127   : > { %v918_v36 = vrot.slane %v890_v33, %v1976_v39  ;;  %1427 = vmatprep.subr.bf16.mxu0 %v1723_v53  ;;  %v1431_v57 = vpack.c.bf16 %v1041_v55, %v1040_v54  ;;  %v1434_v59 = vpack.c.bf16 %v1043_v58, %v1042_v56  ;;  %1419 = vmatprep.mubr.msk.f32.mxu0 %vm1724_vm1, %v1722_v49  ;;  %v961_v2 = vand.u32 127, %v288_v25 }
 0x128   : > { %v886_v45 = vcombine.low %v878_v41, %v885_v44  ;;  %v919_v37 = vcombine.low %v897_v43, %v904_v34  ;;  %1429 = vmatpush3.bf16.msra.mxu0 %v1428_v52  ;;  %1424 = vmatprep.mubr.msk.f32.mxu1 %vm1724_vm1, %v1722_v49  ;;  %v1437_v62 = vpack.c.bf16 %v1045_v61, %v1044_v60 }
 0x129   : > { %v920_v40 = vcombine.low %v911_v35, %v918_v36  ;;  %1430 = vmatprep.subr.bf16.mxu0 %v1723_v53  ;;  %v966_v4 = vadd.s32 4294967288, %v961_v2  ;;  %v973_v5 = vadd.s32 4294967280, %v961_v2  ;;  %v980_v6 = vadd.s32 4294967272, %v961_v2 }
 0x12a   : > { %955 = vperm.xlu1 %1534, %v886_v45   ;;  %v927_v46 = vrot.slane %v919_v37, %v1976_v39  ;;  %v987_v7 = vadd.s32 4294967264, %v961_v2  ;;  %v994_v9 = vadd.s32 4294967256, %v961_v2  ;;  %v1001_v12 = vadd.s32 4294967248, %v961_v2 }
 0x12b   : > { %v934_v47 = vrot.slane %v920_v40, %v1976_v39  ;;  %v969_v8 = vsub.s32 %v966_v4, %v1949_v28  ;;  %v976_v10 = vsub.s32 %v973_v5, %v1949_v28  ;;  %v964_v13 = vsub.s32 %v961_v2, %v1949_v28 }
 0x12c   : > { %1432 = vmatpush3.bf16.msra.mxu0 %v1431_v57  ;;  %v983_v14 = vsub.s32 %v980_v6, %v1949_v28  ;;  %v990_v16 = vsub.s32 %v987_v7, %v1949_v28  ;;  %v997_v17 = vsub.s32 %v994_v9, %v1949_v28  ;;  %v1008_v18 = vadd.s32 4294967240, %v961_v2 }
 0x12d   : > { %v935_v48 = vcombine.low %v927_v46, %v934_v47  ;;  %1433 = vmatprep.subr.bf16.mxu0 %v1723_v53  ;;  %v1004_v20 = vsub.s32 %v1001_v12, %v1949_v28  ;;  %v239_v36 = vld [vmem:[#allocation2] sm:$0x1]  ;;  %v1121_v46 = vld [vmem:[#allocation8] sm:$0xf] }
 0x12e   : > { %v1011_v31 = vsub.s32 %v1008_v18, %v1949_v28  ;;  %1423 = vmatpush3.msk.msra.mxu1 %vm1126_vm10, %v1121_v46 }
 0x12f   : > { %958 = vperm.xlu1 %1534, %v935_v48  }
 0x130   : > { %1435 = vmatpush3.bf16.msra.mxu0 %v1434_v59 }
 0x131   : > { %1436 = vmatprep.subr.bf16.mxu0 %v1723_v53 }
 0x134   : > { %1438 = vmatpush3.bf16.msra.mxu0 %v1437_v62 }
 0x18a   : > { %v938_v15 = vpop.permute.xlu0 %937 }
 0x18b   : > { %v965_v21 = vrot.slane %v938_v15, %v964_v13 }
 0x190   : > { %v941_v63 = vpop.permute.xlu1 %940 }
 0x191   : > { %v970_v25 = vrot.slane %v941_v63, %v969_v8 }
 0x193   : > { %v972_v26 = vsel %vm971_vm2, %v970_v25, %v965_v21 }
 0x194   : > { %v944_v0 = vpop.permute.xlu1 %943 }
 0x195   : > { %v977_v19 = vrot.slane %v944_v0, %v976_v10 }
 0x197   : > { %v979_v29 = vsel %vm978_vm3, %v977_v19, %v972_v26 }
 0x199   : > { %v947_v1 = vpop.permute.xlu1 %946 }
 0x19a   : > { %v984_v22 = vrot.slane %v947_v1, %v983_v14 }
 0x19c   : > { %v986_v41 = vsel %vm985_vm4, %v984_v22, %v979_v29 }
 0x19e   : > { %v950_v3 = vpop.permute.xlu1 %949 }
 0x19f   : > { %v991_v24 = vrot.slane %v950_v3, %v990_v16 }
 0x1a1   : > { %v993_v42 = vsel %vm992_vm5, %v991_v24, %v986_v41 }
 0x1a4   : > { %v953_v11 = vpop.permute.xlu1 %952 }
 0x1a5   : > { %v998_v27 = vrot.slane %v953_v11, %v997_v17 }
 0x1a7   : > { %v1000_v33 = vsel %vm999_vm6, %v998_v27, %v993_v42 }
 0x1a9   : > { %v956_v23 = vpop.permute.xlu1 %955 }
 0x1aa   : > { %v1005_v38 = vrot.slane %v956_v23, %v1004_v20 }
 0x1ac   : > { %v1007_v44 = vsel %vm1006_vm7, %v1005_v38, %v1000_v33 }
 0x1ae   : > { %v959_v32 = vpop.permute.xlu1 %958 }
 0x1af   : > { %v1012_v43 = vrot.slane %v959_v32, %v1011_v31 }
 0x1b1   : > { %v1014_v34 = vsel %vm1013_vm8, %v1012_v43, %v1007_v44 }
 0x1b2   : > { %v1021_v35 = vrot.slane %v1014_v34, %v1976_v39 }
 0x1b4   : > { %v1028_v45 = vrot.slane %v1021_v35, %v1976_v39 }
 0x1b6   : > { %v1030_v37 = vadd.f32 %v1028_v45, %v239_v36 }
 0x1b8   : > { %1032 = vst.msk [vmem:[#allocation2] sm:$0x1] %vm237_vm0, %v1030_v37 }
 0x1bf   : > { %v1036_v28 = vld [vmem:[#allocation2] sm:$0x1] }
 0x1c0   : > { %v1037_v40 = vmul.f32 0.00390625, %v1036_v28 }
 0x1c2   : > { %1420 = vmatmul.mubr.msk.f32.vlgmr.msra.gmra.mrb[0].mxu0 %vm1046_vm9, %v1037_v40 }
 0x295   : > { %v1116_v47 = vpop.f32.mrb[0].mxu0 }
 0x296   : > { %v1120_v48 = vmax.f32 %v1116_v47, 0.0  ;;  %v1421_v49 = vpop.f32.mrb[1].mxu0 }
 0x298   : > { %1425 = vmatmul.mubr.msk.f32.vlgmr.msra.gmra.mrb[0].mxu1 %vm1122_vm11, %v1120_v48 }
 0x36b   : > { %v1196_v50 = vpop.f32.mrb[0].mxu1 }
 0x36c   : > { %v1384_v51 = vmul.f32 -1.442695, %v1196_v50  ;;  %v1426_v52 = vpop.f32.mrb[1].mxu1 }
 0x36e   : > { %1535 = vpow2.f32 %v1384_v51 }
 0x378   : > { %v1536_v39 = vpop.eup %1535 }
 0x379   : > { %v1203_v53 = vadd.f32 1.0, %v1536_v39 }
 0x37b   : > { %1537 = vrcp.f32 %v1203_v53 }
 0x385   : > { %v1538_v54 = vpop.eup %1537 }
 0x386   : > { %v1209_v55 = vrot.slane %v1538_v54, %v1952_v30 }
 0x388   : > { %1215 = vbcast.lane.b32.xlu0 %v1209_v55, 264  ;;  %1211 = vbcast.lane.b32.xlu1 %v1209_v55, 256 }
 0x38c   : > { %1223 = vbcast.lane.b32.xlu0 %v1209_v55, 280  ;;  %1219 = vbcast.lane.b32.xlu1 %v1209_v55, 272 }
 0x390   : > { %1231 = vbcast.lane.b32.xlu0 %v1209_v55, 296  ;;  %1227 = vbcast.lane.b32.xlu1 %v1209_v55, 288 }
 0x394   : > { %1239 = vbcast.lane.b32.xlu0 %v1209_v55, 312  ;;  %1235 = vbcast.lane.b32.xlu1 %v1209_v55, 304 }
 0x3fa   : > { %v1216_v56 = vpop.permute.xlu0 %1215  ;;  %v1212_v57 = vpop.permute.xlu1 %1211 }
 0x3fb   : > { %1243 = vst.msk [vmem:[%s231_s22 + $0x8] sm:$0xff] %vm1241_vm12, %v1216_v56  ;;  %1242 = vst.msk [vmem:[%s231_s22] sm:$0xff] %vm1241_vm12, %v1212_v57 }
 0x3fe   : > { %v1224_v58 = vpop.permute.xlu0 %1223  ;;  %v1220_v30 = vpop.permute.xlu1 %1219 }
 0x3ff   : > { %1245 = vst.msk [vmem:[%s231_s22 + $0x18] sm:$0xff] %vm1241_vm12, %v1224_v58  ;;  %1244 = vst.msk [vmem:[%s231_s22 + $0x10] sm:$0xff] %vm1241_vm12, %v1220_v30 }
 0x402   : > { %v1232_v59 = vpop.permute.xlu0 %1231  ;;  %v1228_v60 = vpop.permute.xlu1 %1227 }
 0x403   : > { %1247 = vst.msk [vmem:[%s231_s22 + $0x28] sm:$0xff] %vm1241_vm12, %v1232_v59  ;;  %1246 = vst.msk [vmem:[%s231_s22 + $0x20] sm:$0xff] %vm1241_vm12, %v1228_v60 }
 0x406   : > { %v1240_v61 = vpop.permute.xlu0 %1239  ;;  %v1236_v62 = vpop.permute.xlu1 %1235 }
 0x407   : > { %1249 = vst.msk [vmem:[%s231_s22 + $0x38] sm:$0xff] %vm1241_vm12, %v1240_v61  ;;  %1248 = vst.msk [vmem:[%s231_s22 + $0x30] sm:$0xff] %vm1241_vm12, %v1236_v62 }
 0x408   : > { %1638 = shalt.err (!%p1635_p11)
}
 0x409   : > { %s1639_s9 = scalar_lea.hbm %s2117_s26, 1024  ;;  %s1643_s29 = scalar_lea.hbm %s2171_s3, 2048 }
 0x40a   : > { %p1640_p0 = scmp.ne.s32.totalorder %s2117_s26, %s1639_s9  ;;  %p1644_p6 = scmp.lt.u32.totalorder %s2117_s26, %s2171_s3 }
 0x40b   : > { %p1645_p7 = scmp.lt.u32.totalorder %s1643_s29, %s1639_s9  ;;  %p1647_p8 = scmp.lt.u32.totalorder %s1639_s9, %s2117_s26 }
 0x40c   : > { %p1641_p4 = pnand %p1640_p0, %p2186_p2 }
 0x40d   : > { %p1646_p12 = por %p1645_p7, %p1644_p6 }
 0x40e   : > { %p1642_p13 = pneg %p1641_p4 }
 0x40f   : > { %p1648_p1 = por %p1647_p8, %p1646_p12 }
 0x411   : > { %p1649_p10 = pnand %p1648_p1, %p1642_p13 }
 0x413   : > { %1652 = shalt.err (!%p1649_p10)
}
 0x414   : > { %s1726_s22 = smov 128   ;;  %s1727_s6 = smov 8  }
 0x415   : > { %1449 = dma.vmem_to_hbm [thread:$0]  (%p2186_p2), %s2110_s24, 1024, %s2117_s26, %s1251_s15, %s1726_s22, %s1726_s22, %s1727_s6  }
 0x416 PF: > { %s1279_s7 = sand.u32 1, %s1691_s12   ;;  %p2187_p3 = scmp.ne.s32.totalorder %s2179_s23, 0 }
 0x417   : > { %p2188_p5 = scmp.ge.s32.totalorder %s1711_s17, 2  ;;  %s1280_s8 = scalar_lea.sflag [#allocation5], %s1279_s7 }
 0x419   : > { %p1463_p9 = pnand %p2188_p5, %p2187_p3 }
 0x41b   : > { %1686 = dma.done.wait (!%p1463_p9), %s1280_s8, 1024  }
 0x41c   : > { %1688 = vsyncadd (!%p1463_p9), %s1280_s8, 4294966272  ;;  %s20_s17 = sadd.s32 1, %s1711_s17   ;;  %s2189_s12 = smov %s1695_s13 }
 0x41d   : > { %p17_p11 = scmp.ge.s32.totalorder %s20_s17, 4   ;;  %s2190_s13 = smov %s1699_s14 }
 0x41e   : > { %s2191_s14 = smov %s1890_s30  ;;  %s2192_s15 = smov %s1707_s16 }
 0x41f   : > { %s2193_s16 = smov %s2195_s11  ;;  %19 = sbr.rel (!%p17_p11) target bundleno = 7 (0x7), region = 93 }
 0x426   :  { %1285 = vsyncpa [#allocation4], 1 }
 0x427   :  { %1287 = vsyncpa [#allocation4 + $0x1], 1 }
 0x428   :  { %1288 = vsyncpa [#allocation7], 1 }
 0x429   :  { %1289 = vsyncpa [#allocation5], 1 }
 0x42a   :  { %1291 = vsyncpa [#allocation5 + $0x1], 1 }

</bundles_post_ra>
